<compile_context>
chip_gen: v6e
topology: v6e:2x2x1
jax: 0.10.0
libtpu: 0.0.40
codegen_flags: <defaults>
</compile_context>

<pallas_src>
import jax
import jax.numpy as jnp
from jax.experimental import pallas as pl
from jax.experimental.pallas import tpu as pltpu


# ----------------------------------------------------------------------------
# Kernel
# ----------------------------------------------------------------------------
def _attention_kernel(g_ref, x_ref, wg_ref, wx_ref, b_ref, wpsi_ref, bpsi_ref,
                      o_ref):
    # Channels live on sublanes, pixels on lanes.
    #   g_ref : (F_g,  T)      x_ref  : (F_l,  T)
    #   wg_ref: (F_int, F_g)   wx_ref : (F_int, F_l)
    #   b_ref : (F_int, 1)     wpsi   : (F_int, 1)    bpsi_ref: SMEM (1,)
    #   o_ref : (F_l,  T)
    # g1 + x1 = Wg.g + Wx.x + (bg + bx)   (BN folded into weights/bias).
    # Everything is per-lane along T, so edge-block OOB lanes stay isolated.
    acc = jnp.dot(wg_ref[...], g_ref[...], preferred_element_type=jnp.float32)
    acc = acc + jnp.dot(wx_ref[...], x_ref[...],
                        preferred_element_type=jnp.float32)
    r = jnp.maximum(acc + b_ref[...], 0.0)                    # (F_int, T) f32
    # psi 1x1 conv (F_int -> 1): VPU multiply + cross-sublane reduce (XLU).
    s = jnp.sum(r * wpsi_ref[...], axis=0, keepdims=True) + bpsi_ref[0]
    psi = jax.nn.sigmoid(s)                                   # (1, T) f32
    # out = x * psi  (broadcast over channel sublanes); lane-dense store.
    o_ref[...] = (x_ref[...].astype(jnp.float32) * psi).astype(o_ref.dtype)


# ----------------------------------------------------------------------------
# Tile-size / VMEM selection (generation aware: v7x has 64 MiB, v5e/v6e 128)
# ----------------------------------------------------------------------------
def _vmem_capacity_bytes():
    try:
        info = pltpu.get_tpu_info()
        return int(getattr(info, "vmem_capacity_bytes", 128 * 1024 * 1024))
    except Exception:
        return 128 * 1024 * 1024


def _round_down_128(t):
    return max(128, (int(t) // 128) * 128)


def _round_up_128(t):
    return ((int(t) + 127) // 128) * 128


def _pick_tile_cols(F_g, F_l, F_int, hw, batch, in_bytes, out_bytes,
                    vmem_limit):
    """Largest 128-multiple pixel-tile that keeps the pipelined set in VMEM."""
    budget = (vmem_limit * 3) // 4          # headroom for compiler scratch
    per_col = (2 * F_g * in_bytes           # double-buffered g tiles
               + 2 * F_l * in_bytes         # double-buffered x tiles
               + 2 * F_l * out_bytes        # double-buffered out tiles
               + 3 * F_int * 4              # f32 acc / r intermediates
               + (F_l + F_int) * 4)         # vreg / spill slack
    t = budget // max(per_col, 1)
    t = min(_round_down_128(t), 8192)
    t = min(t, _round_up_128(hw))
    # Megacore occupancy (v7x: 2 TCs): make sure the parallel grid has >= 2
    # tiles on tiny feature maps.  On 1-TC chips the extra step is negligible.
    while t > 128 and batch * pl.cdiv(hw, t) < 2:
        t = _round_down_128(t // 2)
    return t


# ----------------------------------------------------------------------------
# Wrapper
# ----------------------------------------------------------------------------
def attention_block(g, x, params, *, tile_cols=None, out_dtype=None):
    """g: (B, F_g, H, W), x: (B, F_l, H, W)  (NCHW). Returns NCHW."""
    B, F_g, H, W = g.shape
    _, F_l, _, _ = x.shape
    HW = H * W

    # --- fold BatchNorm (eval) into the 1x1 convs; transpose to (Cout, Cin) --
    def fold(w, b, gamma, beta, mean, var, eps=1e-5):
        scale = gamma / jnp.sqrt(var + eps)
        w_t = (w * scale[None, :]).T              # (Cout, Cin)
        b_f = (b - mean) * scale + beta           # (Cout,)
        return w_t, b_f

    wgT, bg = fold(params["wg"], params["bg"], params["bn_g_gamma"],
                   params["bn_g_beta"], params["bn_g_mean"], params["bn_g_var"])
    wxT, bx = fold(params["wx"], params["bx"], params["bn_x_gamma"],
                   params["bn_x_beta"], params["bn_x_mean"], params["bn_x_var"])
    wpsiT, bpsi = fold(params["wpsi"], params["bpsi"], params["bn_p_gamma"],
                       params["bn_p_beta"], params["bn_p_mean"],
                       params["bn_p_var"])
    F_int = wgT.shape[0]

    bias = (bg + bx).reshape(F_int, 1).astype(jnp.float32)    # pre-added biases
    wpsi_col = wpsiT.reshape(F_int, 1).astype(jnp.float32)    # (F_int, 1)
    bpsi = bpsi.reshape(1).astype(jnp.float32)                # SMEM scalar

    # --- NCHW -> (B, C, H*W): free view, spatial axis on lanes ---------------
    # No astype of g/x here (would be an extra full HBM pass); only the tiny
    # weight matrices are matched to the input dtype for the MXU.
    g3 = g.reshape(B, F_g, HW)
    x3 = x.reshape(B, F_l, HW)
    wgT = wgT.astype(g3.dtype)
    wxT = wxT.astype(x3.dtype)

    out_dt = x.dtype if out_dtype is None else jnp.dtype(out_dtype)

    # --- VMEM budget / tiling over pixels (no padding; edge block is masked) -
    cap = _vmem_capacity_bytes()
    vmem_limit = int(min(max((cap * 3) // 4, 32 * 1024 * 1024),
                         112 * 1024 * 1024))

    if tile_cols is not None:
        T = min(_round_down_128(tile_cols), _round_up_128(HW))
    else:
        T = _pick_tile_cols(F_g, F_l, F_int, HW, B,
                            jnp.dtype(g3.dtype).itemsize,
                            jnp.dtype(out_dt).itemsize, vmem_limit)

    grid = (B, pl.cdiv(HW, T))

    out = pl.pallas_call(
        _attention_kernel,
        out_shape=jax.ShapeDtypeStruct((B, F_l, HW), out_dt),
        grid_spec=pltpu.PrefetchScalarGridSpec(
            num_scalar_prefetch=0,
            grid=grid,
            in_specs=[
                pl.BlockSpec((None, F_g, T), lambda b, t: (b, 0, t)),
                pl.BlockSpec((None, F_l, T), lambda b, t: (b, 0, t)),
                pl.BlockSpec((F_int, F_g), lambda b, t: (0, 0)),
                pl.BlockSpec((F_int, F_l), lambda b, t: (0, 0)),
                pl.BlockSpec((F_int, 1), lambda b, t: (0, 0)),
                pl.BlockSpec((F_int, 1), lambda b, t: (0, 0)),
                pl.BlockSpec(memory_space=pltpu.MemorySpace.SMEM),
            ],
            out_specs=pl.BlockSpec((None, F_l, T), lambda b, t: (b, 0, t)),
        ),
        compiler_params=pltpu.CompilerParams(
            dimension_semantics=("parallel", "parallel"),
            vmem_limit_bytes=vmem_limit,
        ),
    )(g3, x3, wgT, wxT, bias, wpsi_col, bpsi)

    return out.reshape(B, F_l, H, W)


# ----------------------------------------------------------------------------
# Params + pure-JAX reference
# ----------------------------------------------------------------------------
def init_params(key, F_g, F_l, F_int):
    ks = jax.random.split(key, 6)
    return {
        # conv weights stored as (Cin, Cout)
        "wg": jax.random.normal(ks[0], (F_g, F_int), jnp.float32) * 0.1,
        "bg": jax.random.normal(ks[1], (F_int,), jnp.float32) * 0.1,
        "wx": jax.random.normal(ks[2], (F_l, F_int), jnp.float32) * 0.1,
        "bx": jax.random.normal(ks[3], (F_int,), jnp.float32) * 0.1,
        "wpsi": jax.random.normal(ks[4], (F_int, 1), jnp.float32) * 0.1,
        "bpsi": jax.random.normal(ks[5], (1,), jnp.float32) * 0.1,
        # BatchNorm (eval-mode running stats, deterministic)
        "bn_g_gamma": jnp.ones((F_int,), jnp.float32),
        "bn_g_beta": jnp.zeros((F_int,), jnp.float32),
        "bn_g_mean": jnp.zeros((F_int,), jnp.float32),
        "bn_g_var": jnp.ones((F_int,), jnp.float32),
        "bn_x_gamma": jnp.ones((F_int,), jnp.float32),
        "bn_x_beta": jnp.zeros((F_int,), jnp.float32),
        "bn_x_mean": jnp.zeros((F_int,), jnp.float32),
        "bn_x_var": jnp.ones((F_int,), jnp.float32),
        "bn_p_gamma": jnp.ones((1,), jnp.float32),
        "bn_p_beta": jnp.zeros((1,), jnp.float32),
        "bn_p_mean": jnp.zeros((1,), jnp.float32),
        "bn_p_var": jnp.ones((1,), jnp.float32),
    }


def _reference(g, x, params):
    """Pure-JAX reference (eval-mode BatchNorm semantics)."""
    eps = 1e-5

    def bn(y, gamma, beta, mean, var):
        return gamma * (y - mean) / jnp.sqrt(var + eps) + beta

    g2 = jnp.transpose(g, (0, 2, 3, 1))
    x2 = jnp.transpose(x, (0, 2, 3, 1))
    g1 = bn(g2 @ params["wg"] + params["bg"], params["bn_g_gamma"],
            params["bn_g_beta"], params["bn_g_mean"], params["bn_g_var"])
    x1 = bn(x2 @ params["wx"] + params["bx"], params["bn_x_gamma"],
            params["bn_x_beta"], params["bn_x_mean"], params["bn_x_var"])
    r = jnp.maximum(g1 + x1, 0.0)
    s = bn(r @ params["wpsi"] + params["bpsi"], params["bn_p_gamma"],
           params["bn_p_beta"], params["bn_p_mean"], params["bn_p_var"])
    psi = jax.nn.sigmoid(s)
    out = x2 * psi
    return jnp.transpose(out, (0, 3, 1, 2))


if __name__ == "__main__":
    key = jax.random.PRNGKey(0)
    kg, kx, kp = jax.random.split(key, 3)

    # TODO(synk): training-mode BatchNorm (batch statistics) is not modelled;
    # eval-mode running stats are folded into the 1x1 convs.

    # Main check: H*W multiple of 128.
    B, F_g, F_l, F_int, H, W = 2, 4, 4, 32, 16, 16
    g = jax.random.normal(kg, (B, F_g, H, W), jnp.float32)
    x = jax.random.normal(kx, (B, F_l, H, W), jnp.float32)
    params = init_params(kp, F_g, F_l, F_int)

    out = attention_block(g, x, params)
    out = jax.block_until_ready(out)
    ref = _reference(g, x, params)
    assert out.shape == x.shape
    assert jnp.allclose(out, ref, atol=1e-4, rtol=1e-4)

    # Edge-block check: H*W NOT a multiple of 128 (no wrapper pad/slice; the
    # last pixel tile is partially out-of-bounds and masked on store), plus
    # B=1 to exercise the megacore tile-halving path.
    B2, H2, W2 = 1, 12, 12
    g2 = jax.random.normal(kg, (B2, F_g, H2, W2), jnp.float32)
    x2 = jax.random.normal(kx, (B2, F_l, H2, W2), jnp.float32)
    out2 = jax.block_until_ready(attention_block(g2, x2, params))
    ref2 = _reference(g2, x2, params)
    assert out2.shape == x2.shape
    assert jnp.allclose(out2, ref2, atol=1e-4, rtol=1e-4)

    print("KERNEL_OK")
</pallas_src>

<mosaic_0001>
module attributes {stable_mosaic.version = 11 : i64} {
  func.func @_attention_kernel(%arg0: i32, %arg1: i32, %arg2: memref<1x4x256xf32, #tpu.memory_space<vmem>>, %arg3: memref<1x4x256xf32, #tpu.memory_space<vmem>>, %arg4: memref<32x4xf32, #tpu.memory_space<vmem>>, %arg5: memref<32x4xf32, #tpu.memory_space<vmem>>, %arg6: memref<32x1xf32, #tpu.memory_space<vmem>>, %arg7: memref<32x1xf32, #tpu.memory_space<vmem>>, %arg8: memref<1xf32, #tpu.memory_space<smem>>, %arg9: memref<1x4x256xf32, #tpu.memory_space<vmem>>) attributes {dimension_semantics = [#tpu.dimension_semantics<parallel>, #tpu.dimension_semantics<parallel>], iteration_bounds = array<i64: 2, 1>, scalar_prefetch = 0 : i64, scratch_operands = 0 : i64, tpu.core_type = #tpu.core_type<tc>, window_params = [{transform_indices = @transform_0, window_bounds = array<i64: 1, 4, 256>}, {transform_indices = @transform_1, window_bounds = array<i64: 1, 4, 256>}, {pipeline_mode = #tpu.pipeline_mode<synchronous>, transform_indices = @transform_2, window_bounds = array<i64: 32, 4>}, {pipeline_mode = #tpu.pipeline_mode<synchronous>, transform_indices = @transform_3, window_bounds = array<i64: 32, 4>}, {pipeline_mode = #tpu.pipeline_mode<synchronous>, transform_indices = @transform_4, window_bounds = array<i64: 32, 1>}, {pipeline_mode = #tpu.pipeline_mode<synchronous>, transform_indices = @transform_5, window_bounds = array<i64: 32, 1>}, {transform_indices = @transform_6, window_bounds = array<i64: 1>}, {transform_indices = @transform_7, window_bounds = array<i64: 1, 4, 256>}]} {
    %c0 = arith.constant 0 : index
    %c0_0 = arith.constant 0 : index
    %0 = vector.load %arg4[%c0, %c0_0] : memref<32x4xf32, #tpu.memory_space<vmem>>, vector<32x4xf32>
    %c0_1 = arith.constant 0 : index
    %c0_2 = arith.constant 0 : index
    %c0_3 = arith.constant 0 : index
    %1 = vector.load %arg2[%c0_1, %c0_2, %c0_3] : memref<1x4x256xf32, #tpu.memory_space<vmem>>, vector<1x4x256xf32>
    %2 = vector.shape_cast %1 : vector<1x4x256xf32> to vector<4x256xf32>
    %cst = arith.constant dense<0.000000e+00> : vector<32x256xf32>
    %3 = tpu.matmul %0, %2, %cst {dimension_numbers = #tpu.dot_dimension_numbers<[1], [0], [0], [1], [0, 0, 1, 1], [], []>} : vector<32x4xf32>, vector<4x256xf32>, vector<32x256xf32> -> vector<32x256xf32>
    %c0_4 = arith.constant 0 : index
    %c0_5 = arith.constant 0 : index
    %4 = vector.load %arg5[%c0_4, %c0_5] : memref<32x4xf32, #tpu.memory_space<vmem>>, vector<32x4xf32>
    %c0_6 = arith.constant 0 : index
    %c0_7 = arith.constant 0 : index
    %c0_8 = arith.constant 0 : index
    %5 = vector.load %arg3[%c0_6, %c0_7, %c0_8] : memref<1x4x256xf32, #tpu.memory_space<vmem>>, vector<1x4x256xf32>
    %6 = vector.shape_cast %5 : vector<1x4x256xf32> to vector<4x256xf32>
    %cst_9 = arith.constant dense<0.000000e+00> : vector<32x256xf32>
    %7 = tpu.matmul %4, %6, %cst_9 {dimension_numbers = #tpu.dot_dimension_numbers<[1], [0], [0], [1], [0, 0, 1, 1], [], []>} : vector<32x4xf32>, vector<4x256xf32>, vector<32x256xf32> -> vector<32x256xf32>
    %8 = arith.addf %3, %7 : vector<32x256xf32>
    %c0_10 = arith.constant 0 : index
    %c0_11 = arith.constant 0 : index
    %9 = vector.load %arg6[%c0_10, %c0_11] : memref<32x1xf32, #tpu.memory_space<vmem>>, vector<32x1xf32>
    %10 = vector.broadcast %9 : vector<32x1xf32> to vector<32x256xf32>
    %11 = arith.addf %8, %10 : vector<32x256xf32>
    %cst_12 = arith.constant 0.000000e+00 : f32
    %12 = vector.broadcast %cst_12 : f32 to vector<32x256xf32>
    %13 = arith.maximumf %11, %12 : vector<32x256xf32>
    %c0_13 = arith.constant 0 : index
    %c0_14 = arith.constant 0 : index
    %14 = vector.load %arg7[%c0_13, %c0_14] : memref<32x1xf32, #tpu.memory_space<vmem>>, vector<32x1xf32>
    %15 = vector.broadcast %14 : vector<32x1xf32> to vector<32x256xf32>
    %16 = arith.mulf %13, %15 : vector<32x256xf32>
    %cst_15 = arith.constant dense<0.000000e+00> : vector<256xf32>
    %17 = vector.multi_reduction <add>, %16, %cst_15 [0] : vector<32x256xf32> to vector<256xf32>
    %18 = vector.shape_cast %17 : vector<256xf32> to vector<1x256xf32>
    %c0_16 = arith.constant 0 : index
    %19 = memref.load %arg8[%c0_16] : memref<1xf32, #tpu.memory_space<smem>>
    %20 = vector.broadcast %19 : f32 to vector<1x256xf32>
    %21 = arith.addf %18, %20 : vector<1x256xf32>
    %22 = arith.negf %21 : vector<1x256xf32>
    %23 = math.exp %22 : vector<1x256xf32>
    %cst_17 = arith.constant 1.000000e+00 : f32
    %24 = vector.broadcast %cst_17 : f32 to vector<1x256xf32>
    %25 = arith.addf %24, %23 : vector<1x256xf32>
    %26 = arith.divf %24, %25 : vector<1x256xf32>
    %c0_18 = arith.constant 0 : index
    %c0_19 = arith.constant 0 : index
    %c0_20 = arith.constant 0 : index
    %27 = vector.load %arg3[%c0_18, %c0_19, %c0_20] : memref<1x4x256xf32, #tpu.memory_space<vmem>>, vector<1x4x256xf32>
    %28 = vector.shape_cast %27 : vector<1x4x256xf32> to vector<4x256xf32>
    %29 = vector.broadcast %26 : vector<1x256xf32> to vector<4x256xf32>
    %30 = arith.mulf %28, %29 : vector<4x256xf32>
    %c0_21 = arith.constant 0 : index
    %c0_22 = arith.constant 0 : index
    %c0_23 = arith.constant 0 : index
    %31 = vector.load %arg9[%c0_21, %c0_22, %c0_23] : memref<1x4x256xf32, #tpu.memory_space<vmem>>, vector<1x4x256xf32>
    %32 = vector.shape_cast %31 : vector<1x4x256xf32> to vector<4x256xf32>
    %33 = vector.shape_cast %30 : vector<4x256xf32> to vector<1x4x256xf32>
    tpu.vector_store %arg9[%c0_21, %c0_22, %c0_23], %33 {strides = array<i32>} : memref<1x4x256xf32, #tpu.memory_space<vmem>>, vector<1x4x256xf32>,
    return
  }
  func.func @transform_0(%arg0: i32, %arg1: i32) -> (i32, i32, i32) {
    %c0_i32 = arith.constant 0 : i32
    %c0_i32_0 = arith.constant 0 : i32
    return %arg0, %c0_i32, %arg1 : i32, i32, i32
  }
  func.func @transform_1(%arg0: i32, %arg1: i32) -> (i32, i32, i32) {
    %c0_i32 = arith.constant 0 : i32
    %c0_i32_0 = arith.constant 0 : i32
    return %arg0, %c0_i32, %arg1 : i32, i32, i32
  }
  func.func @transform_2(%arg0: i32, %arg1: i32) -> (i32, i32) {
    %c0_i32 = arith.constant 0 : i32
    %c0_i32_0 = arith.constant 0 : i32
    %c0_i32_1 = arith.constant 0 : i32
    return %c0_i32, %c0_i32_0 : i32, i32
  }
  func.func @transform_3(%arg0: i32, %arg1: i32) -> (i32, i32) {
    %c0_i32 = arith.constant 0 : i32
    %c0_i32_0 = arith.constant 0 : i32
    %c0_i32_1 = arith.constant 0 : i32
    return %c0_i32, %c0_i32_0 : i32, i32
  }
  func.func @transform_4(%arg0: i32, %arg1: i32) -> (i32, i32) {
    %c0_i32 = arith.constant 0 : i32
    %c0_i32_0 = arith.constant 0 : i32
    %c0_i32_1 = arith.constant 0 : i32
    return %c0_i32, %c0_i32_0 : i32, i32
  }
  func.func @transform_5(%arg0: i32, %arg1: i32) -> (i32, i32) {
    %c0_i32 = arith.constant 0 : i32
    %c0_i32_0 = arith.constant 0 : i32
    %c0_i32_1 = arith.constant 0 : i32
    return %c0_i32, %c0_i32_0 : i32, i32
  }
  func.func @transform_6(%arg0: i32, %arg1: i32) -> i32 {
    %c0_i32 = arith.constant 0 : i32
    %c0_i32_0 = arith.constant 0 : i32
    return %c0_i32 : i32
  }
  func.func @transform_7(%arg0: i32, %arg1: i32) -> (i32, i32, i32) {
    %c0_i32 = arith.constant 0 : i32
    %c0_i32_0 = arith.constant 0 : i32
    return %arg0, %c0_i32, %arg1 : i32, i32, i32
  }
}

</mosaic_0001>

<bundles_post_ra>
// kernel: tpu_custom_call.1
= control target key start
LH: loop header
LB: loop body
LE: loop exit
PB: predicated region body
PF: predicated region fallthrough
CT: control target
= control target key end

     0   :  { %s1183_s0 = inlined_call_operand.vmem [shape: f32[2,4,256], index: 0, kind: input, shape index: {}]   ;;  %s1184_s1 = inlined_call_operand.vmem [shape: f32[2,4,256], index: 1, kind: input, shape index: {}]   ;;  %s1185_s2 = inlined_call_operand.vmem [shape: f32[32,4], index: 2, kind: input, shape index: {}]   ;;  %s1186_s3 = inlined_call_operand.vmem [shape: f32[32,4], index: 3, kind: input, shape index: {}]   ;;  %s1187_s4 = inlined_call_operand.vmem [shape: f32[32,1], index: 4, kind: input, shape index: {}]   ;;  %s1188_s5 = inlined_call_operand.vmem [shape: f32[32,1], index: 5, kind: input, shape index: {}]   ;;  %s1189_s6 = inlined_call_operand.<no memory space> [shape: f32[1], index: 6, kind: input, shape index: {}]   ;;  %s1190_s7 = inlined_call_operand.hbm [shape: f32[2,4,256], index: 7, kind: output, shape index: {}]  }
   0x1   :  { %12 = sst [smem:[#allocation2]] %s1189_s6 }
   0x2   :  { %13 = vsyncpa [#allocation4], 0 }
   0x3   :  { %15 = vsyncpa [#allocation4 + $0x1], 0  ;;  %s1019_s26 = smov 0   ;;  %s1021_s27 = smov 0  }
   0x4   :  { %s1023_s28 = smov 0   ;;  %s1025_s29 = smov 0  }
   0x5   :  { %s1027_s30 = smov 0   ;;  %s1029_s8 = smov 0  }
   0x6 LB: > { %s794_s6 = sadd.s32 4294967295, %s971_s8   ;;  %s795_s9 = sadd.s32 4294967294, %s971_s8   ;;  %s971_s8 = sphi %s1029_s8, %s21_s8   ;;  %s967_s30 = sphi %s1027_s30, %s1197_s30   ;;  %s963_s29 = sphi %s1025_s29, %s1196_s29   ;;  %s959_s28 = sphi %s1023_s28, %s1195_s28   ;;  %s955_s27 = sphi %s1021_s27, %s1194_s27   ;;  %s951_s26 = sphi %s1019_s26, %s1193_s26  }
   0x7   : > { %s33_s10 = sadd.s32 1, %s967_s30  ;;  %s203_s11 = sadd.s32 1, %s959_s28 }
   0x8   : > { %p35_p0 = scmp.ge.s32.totalorder %s33_s10, 2  ;;  %p213_p1 = scmp.ne.s32.totalorder %s959_s28, %s955_s27 }
   0x9   : > { %p214_p2 = scmp.eq.s32.totalorder %s794_s6, 1  ;;  %p219_p3 = scmp.ne.s32.totalorder %s955_s27, %s951_s26 }
   0xa   : > { %s1199_s10 = smov (%p35_p0, %s33_s10), 0  ;;  %p220_p5 = scmp.eq.s32.totalorder %s795_s9, 1 }
   0xb   : > { %p1059_p4 = por %p214_p2, %p213_p1  ;;  %s198_s13 = ssub.s32 %s967_s30, %s1199_s10 }
   0xc   : > { %p798_p6 = scmp.ge.s32.totalorder %s971_s8, 1  ;;  %p201_p7 = scmp.eq.s32.totalorder %s198_s13, 0 }
   0xd   : > { %p1066_p8 = por %p220_p5, %p219_p3  ;;  %p279_p9 = scmp.lt.s32.totalorder %s971_s8, 3 }
   0xe   : > { %s1072_s15 = scalar_select %p201_p7, %s959_s28, %s203_s11  }
   0xf   : > { %p280_p10 = pnand %p798_p6, %p279_p9 }
  0x10   : > { %p325_p11 = scmp.lt.s32.totalorder (!%p280_p10), %s963_s29, 1  ;;  %s661_s11 = sld [smem:[#allocation2]] (!%p280_p10) }
  0x11   : > { %283 = sbr.rel (%p280_p10) target bundleno = 312 (0x138), region = 48  ;;  %s321_s13 = sand.u32 (!%p280_p10), 1, %s955_s27  }
  0x12   : > { %s799_s17 = sshll.u32 (!%p280_p10), %s321_s13, 3  ;;  %s825_s18 = sshll.u32 (!%p280_p10), %s963_s29, 7 }
  0x13   : > { %s698_s22 = scalar_lea.hbm (!%p280_p10), %s1190_s7, %s825_s18  ;;  %s684_s23 = scalar_lea.sflag (!%p280_p10), [#allocation4], %s321_s13 }
  0x14   : > { %s975_s25 = smov (!%p280_p10), [#allocation3]  }
  0x15   : > { %s899_s6 = sshll.u32 (!%p280_p10), %s975_s25, 4  ;;  %s900_s6 = int_to_ptr.vmem [resolvable:$false] %s899_s6 }
  0x16   : > { %v973_v0 = vmov 0.0   ;;  %s326_s16 = scalar_select %p325_p11, %s963_s29, 1  ;;  %v974_v1 = vmov 0   ;;  %v571_v2 = vld [vmem:[%s1187_s4] sm:$0xff]  ;;  %v573_v3 = vld [vmem:[%s1187_s4 + $0x10] sm:$0xff]  ;;  %v572_v4 = vld [vmem:[%s1187_s4 + $0x8] sm:$0xff] }
  0x17   : > { %439 = vmatprep.mubr.f32.mxu0 %v973_v0  ;;  %546 = vmatprep.mubr.f32.mxu1 %v973_v0  ;;  %v574_v5 = vld [vmem:[%s1187_s4 + $0x18] sm:$0xff]  ;;  %vm370_vm0 = vcmask 1043456   ;;  %v350_v10 = vld [vmem:[%s1186_s3] sm:$0xff]  ;;  %vm357_vm1 = vcmask 31744   ;;  %v612_v13 = vld [vmem:[%s1188_s5 + $0x8] sm:$0xff]  ;;  %s901_s29 = scalar_lea.vmem %s900_s6, 256 }
  0x18   : > { %883 = vset.pattern.permute.xlu0 %v974_v1  ;;  %884 = vset.pattern.permute.xlu1 %v974_v1  ;;  %s823_s21 = sshll.u32 %s326_s16, 3  ;;  %v345_v11 = vld [vmem:[%s1185_s2] sm:$0xff]  ;;  %v351_v14 = vld [vmem:[%s1186_s3 + $0x8] sm:$0xff]  ;;  %v613_v16 = vld [vmem:[%s1188_s5 + $0x10] sm:$0xff]  ;;  %s323_s16 = scalar_lea.vmem [#allocation3], %s799_s17 }
  0x19   : > { %577 = vperm.xlu0 %883, %v571_v2   ;;  %587 = vperm.xlu1 %884, %v573_v3   ;;  %s342_s24 = scalar_lea.vmem %s1184_s1, %s823_s21  ;;  %s332_s9 = scalar_lea.vmem %s1183_s0, %s823_s21  ;;  %v611_v12 = vld [vmem:[%s1188_s5] sm:$0xff]  ;;  %v346_v15 = vld [vmem:[%s1185_s2 + $0x8] sm:$0xff]  ;;  %v614_v17 = vld [vmem:[%s1188_s5 + $0x18] sm:$0xff] }
  0x1a   : > { %v1094_v6 = vld [vmem:[%s342_s24] sm:$0xff]  ;;  %v352_v18 = vld [vmem:[%s1186_s3 + $0x10] sm:$0xff]  ;;  %v353_v20 = vld [vmem:[%s1186_s3 + $0x18] sm:$0xff]  ;;  %s700_s19 = sshll.u32 %s323_s16, 4  ;;  %s701_s19 = int_to_ptr.vmem [resolvable:$true] %s700_s19 }
  0x1b   : > { %v349_v7 = vld [vmem:[%s332_s9] sm:$0xff]  ;;  %v356_v8 = vcombine.high %v1094_v6, %v1094_v6  ;;  %v347_v19 = vld [vmem:[%s1185_s2 + $0x10] sm:$0xff]  ;;  %v348_v21 = vld [vmem:[%s1185_s2 + $0x18] sm:$0xff]  ;;  %s895_s24 = scalar_lea.vmem %s701_s19, 128  ;;  %p902_p1 = scmp.lt.s32.totalorder %s701_s19, %s900_s6 }
  0x1c   : > { %v465_v9 = vcombine.high %v349_v7, %v349_v7  ;;  %p896_p12 = scmp.ne.s32.totalorder %s701_s19, %s895_s24  ;;  %p903_p2 = scmp.lt.s32.totalorder %s901_s29, %s895_s24 }
  0x1d   : > { %582 = vperm.xlu0 %883, %v572_v4   ;;  %592 = vperm.xlu1 %884, %v574_v5  }
  0x1e   : > { %804 = vmatprep.subr.msk.mxu0 %vm370_vm0, %v356_v8  ;;  %810 = vmatprep.subr.msk.mxu1 %vm370_vm0, %v465_v9  ;;  %p897_p13 = pnand %p896_p12, %p1059_p4  ;;  %p904_p3 = por %p903_p2, %p902_p1 }
  0x1f   : > { %805 = vmatpush1.msk.msra.mxu0 %vm370_vm0, %v1094_v6  ;;  %811 = vmatpush1.msk.msra.mxu1 %vm370_vm0, %v349_v7 }
  0x20   : > { %806 = vmatmul.mubr.msk.f32.vlgmr.msra.gmra.mxu0 %vm357_vm1, %v350_v10  ;;  %812 = vmatmul.mubr.msk.f32.vlgmr.msra.gmra.mxu1 %vm357_vm1, %v345_v11  ;;  %p898_p0 = pneg %p897_p13 }
  0x21   : > { %445 = vmatprep.mubr.f32.mxu0 %v973_v0  ;;  %552 = vmatprep.mubr.f32.mxu1 %v973_v0 }
  0x22   : > { %617 = vperm.xlu0 %883, %v611_v12   ;;  %622 = vperm.xlu1 %884, %v612_v13   ;;  %p905_p5 = pnand %p904_p3, %p898_p0 }
  0x24   : > { %807 = vmatmul.mubr.msk.f32.gmra.mxu0 %vm357_vm1, %v351_v14  ;;  %813 = vmatmul.mubr.msk.f32.gmra.mxu1 %vm357_vm1, %v346_v15 }
  0x25   : > { %451 = vmatprep.mubr.f32.mxu0 %v973_v0  ;;  %558 = vmatprep.mubr.f32.mxu1 %v973_v0 }
  0x26   : > { %627 = vperm.xlu0 %883, %v613_v16   ;;  %632 = vperm.xlu1 %884, %v614_v17  }
  0x28   : > { %808 = vmatmul.mubr.msk.f32.gmra.mxu0 %vm357_vm1, %v352_v18  ;;  %814 = vmatmul.mubr.msk.f32.gmra.mxu1 %vm357_vm1, %v347_v19 }
  0x29   : > { %457 = vmatprep.mubr.f32.mxu0 %v973_v0  ;;  %564 = vmatprep.mubr.f32.mxu1 %v973_v0 }
  0x2c   : > { %809 = vmatmul.mubr.msk.f32.gmra.mxu0 %vm357_vm1, %v353_v20  ;;  %815 = vmatmul.mubr.msk.f32.gmra.mxu1 %vm357_vm1, %v348_v21 }
  0x94   : > { %v578_v22 = vpop.permute.xlu0 %577  ;;  %v588_v25 = vpop.permute.xlu1 %587 }
  0x98   : > { %v583_v28 = vpop.permute.xlu0 %582  ;;  %v593_v36 = vpop.permute.xlu1 %592 }
  0x9d   : > { %v618_v42 = vpop.permute.xlu0 %617  ;;  %v623_v56 = vpop.permute.xlu1 %622 }
  0xa1   : > { %v628_v63 = vpop.permute.xlu0 %627  ;;  %v633_v13 = vpop.permute.xlu1 %632 }
  0xe0   : > { %v441_v23 = vpop.f32.mrf.mxu0  ;;  %v548_v24 = vpop.f32.mrf.mxu1 }
  0xe1   : > { %v549_v29 = vadd.f32 %v548_v24, %v441_v23 }
  0xe2   : > { %v443_v26 = vpop.f32.mrf.mxu0  ;;  %v550_v27 = vpop.f32.mrf.mxu1 }
  0xe3   : > { %v551_v32 = vadd.f32 %v550_v27, %v443_v26  ;;  %v595_v39 = vadd.f32 %v578_v22, %v549_v29 }
  0xe4   : > { %v447_v30 = vpop.f32.mrf.mxu0  ;;  %v554_v31 = vpop.f32.mrf.mxu1 }
  0xe5   : > { %v555_v33 = vadd.f32 %v554_v31, %v447_v30  ;;  %v596_v43 = vadd.f32 %v578_v22, %v551_v32  ;;  %v603_v52 = vmax.f32 %v595_v39, 0.0  ;;  %v662_v30 = vstv %s661_s11 }
  0xe6   : > { %v449_v34 = vpop.f32.mrf.mxu0  ;;  %v556_v35 = vpop.f32.mrf.mxu1 }
  0xe7   : > { %v597_v37 = vadd.f32 %v583_v28, %v555_v33  ;;  %v557_v38 = vadd.f32 %v556_v35, %v449_v34  ;;  %v604_v55 = vmax.f32 %v596_v43, 0.0  ;;  %v635_v3 = vmul.f32 %v618_v42, %v603_v52 }
  0xe8   : > { %v453_v40 = vpop.f32.mrf.mxu0  ;;  %v560_v41 = vpop.f32.mrf.mxu1 }
  0xe9   : > { %v598_v44 = vadd.f32 %v583_v28, %v557_v38  ;;  %v561_v45 = vadd.f32 %v560_v41, %v453_v40  ;;  %v605_v46 = vmax.f32 %v597_v37, 0.0  ;;  %v636_v7 = vmul.f32 %v618_v42, %v604_v55 }
  0xea   : > { %v455_v47 = vpop.f32.mrf.mxu0  ;;  %v562_v48 = vpop.f32.mrf.mxu1 }
  0xeb   : > { %v606_v49 = vmax.f32 %v598_v44, 0.0  ;;  %v599_v50 = vadd.f32 %v588_v25, %v561_v45  ;;  %v563_v51 = vadd.f32 %v562_v48, %v455_v47  ;;  %v637_v59 = vmul.f32 %v623_v56, %v605_v46 }
  0xec   : > { %v459_v53 = vpop.f32.mrf.mxu0  ;;  %v566_v54 = vpop.f32.mrf.mxu1 }
  0xed   : > { %v607_v57 = vmax.f32 %v599_v50, 0.0  ;;  %v600_v58 = vadd.f32 %v588_v25, %v563_v51  ;;  %v567_v60 = vadd.f32 %v566_v54, %v459_v53  ;;  %v638_v0 = vmul.f32 %v623_v56, %v606_v49 }
  0xee   : > { %v461_v61 = vpop.f32.mrf.mxu0  ;;  %v568_v62 = vpop.f32.mrf.mxu1  ;;  %v643_v10 = vadd.f32 %v637_v59, %v635_v3 }
  0xef   : > { %v608_v1 = vmax.f32 %v600_v58, 0.0  ;;  %v569_v2 = vadd.f32 %v568_v62, %v461_v61  ;;  %v639_v4 = vmul.f32 %v628_v63, %v607_v57  ;;  %v601_v5 = vadd.f32 %v593_v36, %v567_v60 }
  0xf0   : > { %v652_v12 = vadd.f32 %v638_v0, %v636_v7 }
  0xf1   : > { %v640_v8 = vmul.f32 %v628_v63, %v608_v1  ;;  %v602_v9 = vadd.f32 %v593_v36, %v569_v2  ;;  %v609_v11 = vmax.f32 %v601_v5, 0.0  ;;  %v644_v15 = vadd.f32 %v643_v10, %v639_v4 }
  0xf3   : > { %v610_v14 = vmax.f32 %v602_v9, 0.0  ;;  %v641_v16 = vmul.f32 %v633_v13, %v609_v11  ;;  %v653_v17 = vadd.f32 %v652_v12, %v640_v8 }
  0xf5   : > { %v642_v18 = vmul.f32 %v633_v13, %v610_v14  ;;  %v645_v19 = vadd.f32 %v644_v15, %v641_v16 }
  0xf7   : > { %v654_v20 = vadd.f32 %v653_v17, %v642_v18  ;;  %v646_v21 = vrot.slane %v645_v19, 4 }
  0xf9   : > { %v655_v22 = vrot.slane %v654_v20, 4  ;;  %v647_v23 = vadd.f32 %v646_v21, %v645_v19 }
  0xfb   : > { %v656_v24 = vadd.f32 %v655_v22, %v654_v20  ;;  %v648_v25 = vrot.slane %v647_v23, 2 }
  0xfd   : > { %v657_v26 = vrot.slane %v656_v24, 2  ;;  %v649_v27 = vadd.f32 %v648_v25, %v647_v23 }
  0xff   : > { %v658_v28 = vadd.f32 %v657_v26, %v656_v24  ;;  %v650_v29 = vrot.slane %v649_v27, 1 }
 0x101   : > { %v659_v31 = vrot.slane %v658_v28, 1  ;;  %v651_v32 = vadd.f32 %v650_v29, %v649_v27 }
 0x103   : > { %v660_v33 = vadd.f32 %v659_v31, %v658_v28  ;;  %v663_v34 = vadd.f32 %v662_v30, %v651_v32 }
 0x105   : > { %v664_v35 = vadd.f32 %v662_v30, %v660_v33  ;;  %v816_v36 = vmul.f32 -1.442695, %v663_v34 }
 0x107   : > { %v817_v37 = vmul.f32 -1.442695, %v664_v35  ;;  %887 = vpow2.f32 %v816_v36 }
 0x109   : > { %889 = vpow2.f32 %v817_v37 }
 0x114   : > { %v888_v38 = vpop.eup %887 }
 0x115   : > { %v671_v40 = vadd.f32 1.0, %v888_v38 }
 0x116   : > { %v890_v39 = vpop.eup %889 }
 0x117   : > { %v672_v41 = vadd.f32 1.0, %v890_v39  ;;  %891 = vrcp.f32 %v671_v40 }
 0x119   : > { %893 = vrcp.f32 %v672_v41 }
 0x124   : > { %v892_v42 = vpop.eup %891 }
 0x126   : > { %v894_v43 = vpop.eup %893 }
 0x127   : > { %v679_v44 = vcombine.low %v892_v42, %v894_v43 }
 0x129   : > { %v681_v45 = vmul.f32 %v679_v44, %v1094_v6 }
 0x12b   : > { %682 = vst [vmem:[%s323_s16] sm:$0xff] %v681_v45 }
 0x12c   : > { %908 = shalt.err (!%p905_p5)
}
 0x12d   : > { %s909_s9 = scalar_lea.hbm %s698_s22, 128  ;;  %s913_s17 = scalar_lea.hbm %s1190_s7, 256 }
 0x12e   : > { %p910_p6 = scmp.ne.s32.totalorder %s698_s22, %s909_s9  ;;  %p914_p10 = scmp.lt.s32.totalorder %s698_s22, %s1190_s7 }
 0x12f   : > { %p915_p11 = scmp.lt.s32.totalorder %s913_s17, %s909_s9 }
 0x130   : > { %p911_p7 = pnand %p910_p6, %p1059_p4 }
 0x131   : > { %p916_p12 = por %p915_p11, %p914_p10 }
 0x132   : > { %p912_p9 = pneg %p911_p7 }
 0x134   : > { %p917_p13 = pnand %p916_p12, %p912_p9 }
 0x136   : > { %920 = shalt.err (!%p917_p13)
}
 0x137   : > { %826 = dma.vmem_to_hbm [thread:$0]  (%p1059_p4), %s701_s19, 128, %s698_s22, %s684_s23  }
 0x138 PF: > { %p832_p0 = scmp.ge.s32.totalorder %s971_s8, 2  ;;  %s712_s20 = sand.u32 1, %s951_s26  }
 0x139   : > { %s713_s21 = scalar_lea.sflag [#allocation4], %s712_s20 }
 0x13a   : > { %p829_p1 = pnand %p832_p0, %p1066_p8 }
 0x13c   : > { %p830_p2 = pneg %p829_p1 }
 0x13e   : > { %946 = dma.done.wait (%p830_p2), %s713_s21, 128  }
 0x13f   : > { %948 = vsyncadd (%p830_p2), %s713_s21, 4294967168  ;;  %s21_s8 = sadd.s32 1, %s971_s8   ;;  %s1193_s26 = smov %s955_s27 }
 0x140   : > { %p18_p3 = scmp.ge.s32.totalorder %s21_s8, 4   ;;  %s1194_s27 = smov %s959_s28 }
 0x141   : > { %s1195_s28 = smov %s1072_s15  ;;  %s1196_s29 = smov %s967_s30 }
 0x142   : > { %s1197_s30 = smov %s1199_s10  ;;  %20 = sbr.rel (!%p18_p3) target bundleno = 6 (0x6), region = 86 }
 0x147   :  { %718 = vsyncpa [#allocation4], 1 }
 0x148   :  { %720 = vsyncpa [#allocation4 + $0x1], 1 }

</bundles_post_ra>
